<compile_context>
chip_gen: v7x
topology: tpu7x:2x2x1
jax: 0.10.0
libtpu: 0.0.40
codegen_flags: <defaults>
</compile_context>

<pallas_src>
import functools

import jax
import jax.numpy as jnp
from jax.experimental import pallas as pl
from jax.experimental.pallas import tpu as pltpu

EPS = 1e-6
VMEM_LIMIT = 64 * 1024 * 1024


def _round_up(n, m):
    return ((n + m - 1) // m) * m


# ----------------------------- in-kernel math -----------------------------

def _gelu(x):
    # tanh-approx GELU (== torch GELU(approximate='tanh')); tanh runs on the
    # EUP slot instead of a ~10-op VALU erf polynomial chain.
    c = 0.7978845608028654  # sqrt(2/pi)
    return 0.5 * x * (1.0 + jnp.tanh(c * (x + 0.044715 * x * x * x)))


def _layernorm(x, g, b, eps=EPS):
    mu = jnp.mean(x, axis=-1, keepdims=True)
    xc = x - mu
    var = jnp.mean(xc * xc, axis=-1, keepdims=True)
    return xc * jax.lax.rsqrt(var + eps) * g + b


def _softmax(a):
    m = jnp.max(a, axis=-1, keepdims=True)
    e = jnp.exp(a - m)
    s = jnp.sum(e, axis=-1, keepdims=True)
    return e * pl.reciprocal(s, approx=True)   # divide -> EUP slot


# ----------------------------- Pallas kernels -----------------------------

def _embed_kernel(p_ref, w_ref, b_ref, cls_ref, pos_ref, o_ref):
    # Patch projection (== stride-p conv) fused with cls-token prepend,
    # learned pos-embed add and zero padding of the sequence.
    proj = (jnp.dot(p_ref[0], w_ref[...], preferred_element_type=jnp.float32)
            + b_ref[...])                                   # (P, D) f32
    P, D = proj.shape
    n_pad = pos_ref.shape[0]
    pieces = [cls_ref[...], proj]
    if n_pad - 1 - P > 0:
        pieces.append(jnp.zeros((n_pad - 1 - P, D), jnp.float32))
    tokens = jnp.concatenate(pieces, axis=0)                # (n_pad, D)
    o_ref[0] = tokens + pos_ref[...]


def _blocks_kernel(x_ref, ln1g_ref, ln1b_ref, wqkv_ref, bqkv_ref,
                   wproj_ref, bproj_ref, ln2g_ref, ln2b_ref,
                   w1_ref, b1_ref, w2_ref, b2_ref, ng_ref, nb_ref,
                   o_ref, state_ref, ctx_ref,
                   *, num_heads, head_dim, n_valid):
    d_idx = pl.program_id(1)
    n_blocks = pl.num_programs(1)
    dim = num_heads * head_dim
    scale = head_dim ** -0.5

    # First layer of this batch element: load the residual stream into VMEM.
    @pl.when(d_idx == 0)
    def _():
        state_ref[...] = x_ref[0]

    x = state_ref[...]                                      # (Np, D) f32
    np_tokens = x.shape[0]

    # ---- Attention branch: x + proj(softmax(q k^T / sqrt(hd)) v) ----
    xn = _layernorm(x, ln1g_ref[0], ln1b_ref[0]).astype(jnp.bfloat16)
    qkv = (jnp.dot(xn, wqkv_ref[0], preferred_element_type=jnp.float32)
           + bqkv_ref[0])                                   # (Np, 3D) f32

    # Mask padded key columns (sequence padded to a lane-friendly length).
    col_ids = jax.lax.broadcasted_iota(jnp.int32, (1, np_tokens), 1)
    key_bias = jnp.where(col_ids < n_valid, 0.0, -1e30).astype(jnp.float32)

    for h in range(num_heads):          # static loop; results go to VMEM slice
        lo = h * head_dim
        q = (qkv[:, lo:lo + head_dim] * scale).astype(jnp.bfloat16)
        k = qkv[:, dim + lo:dim + lo + head_dim].astype(jnp.bfloat16)
        v = qkv[:, 2 * dim + lo:2 * dim + lo + head_dim].astype(jnp.bfloat16)
        scores = jax.lax.dot_general(
            q, k, (((1,), (1,)), ((), ())),
            preferred_element_type=jnp.float32)             # (Np, Np)
        attn = _softmax(scores + key_bias)
        ctx_ref[:, lo:lo + head_dim] = jnp.dot(
            attn.astype(jnp.bfloat16), v, preferred_element_type=jnp.float32)

    attn_out = (jnp.dot(ctx_ref[...].astype(jnp.bfloat16), wproj_ref[0],
                        preferred_element_type=jnp.float32) + bproj_ref[0])
    x = x + attn_out

    # ---- MLP branch: x + fc2(gelu(fc1(LN(x)))) ----
    xn2 = _layernorm(x, ln2g_ref[0], ln2b_ref[0]).astype(jnp.bfloat16)
    h1 = (jnp.dot(xn2, w1_ref[0], preferred_element_type=jnp.float32)
          + b1_ref[0])
    h1 = _gelu(h1).astype(jnp.bfloat16)
    mlp_out = (jnp.dot(h1, w2_ref[0], preferred_element_type=jnp.float32)
               + b2_ref[0])
    x = x + mlp_out
    # TODO(synk): MoE adapter branch (adaptmlp(x, m)) omitted — MoE not provided.

    state_ref[...] = x

    # Last layer: fuse the final LayerNorm and emit the output once.
    @pl.when(d_idx == n_blocks - 1)
    def _():
        o_ref[0] = _layernorm(x, ng_ref[...], nb_ref[...])


# ----------------------------- wrappers -----------------------------

def _patch_embed(x_nchw, w, b, cls_tok, pos_pad, patch, n_pad):
    B, C, H, W = x_nchw.shape
    gh, gw = H // patch, W // patch
    P = gh * gw
    Kp = C * patch * patch
    Kp_pad, D = w.shape
    # NCHW -> (B, gh, gw, C, ph, pw) -> (B, P, C*ph*pw); plain-JAX glue.
    p = x_nchw.reshape(B, C, gh, patch, gw, patch)
    p = p.transpose(0, 2, 4, 1, 3, 5).reshape(B, P, Kp)
    if Kp_pad != Kp:
        p = jnp.pad(p, ((0, 0), (0, 0), (0, Kp_pad - Kp)))
    p = p.astype(jnp.bfloat16)
    return pl.pallas_call(
        _embed_kernel,
        out_shape=jax.ShapeDtypeStruct((B, n_pad, D), jnp.float32),
        grid=(B,),
        in_specs=[
            pl.BlockSpec((1, P, Kp_pad), lambda i: (i, 0, 0)),
            pl.BlockSpec((Kp_pad, D), lambda i: (0, 0)),
            pl.BlockSpec((1, D), lambda i: (0, 0)),
            pl.BlockSpec((1, D), lambda i: (0, 0)),
            pl.BlockSpec((n_pad, D), lambda i: (0, 0)),
        ],
        out_specs=pl.BlockSpec((1, n_pad, D), lambda i: (i, 0, 0)),
        compiler_params=pltpu.CompilerParams(
            dimension_semantics=("parallel",),
            vmem_limit_bytes=VMEM_LIMIT),
    )(p, w, b, cls_tok, pos_pad)


def _stacked_spec(shape):
    # Per-layer stacked parameter (depth, ...): depth selected by grid axis 1.
    zeros = (0,) * (len(shape) - 1)
    return pl.BlockSpec((1,) + tuple(shape[1:]),
                        lambda b, d, z=zeros: (d,) + z)


def _run_blocks(x, p, num_heads, n_valid):
    B, Np, D = x.shape
    depth = p["wqkv"].shape[0]
    head_dim = D // num_heads

    kernel = functools.partial(_blocks_kernel, num_heads=num_heads,
                               head_dim=head_dim, n_valid=n_valid)
    const2d = pl.BlockSpec((1, D), lambda b, d: (0, 0))
    return pl.pallas_call(
        kernel,
        out_shape=jax.ShapeDtypeStruct((B, Np, D), jnp.float32),
        grid=(B, depth),
        in_specs=[
            pl.BlockSpec((1, Np, D), lambda b, d: (b, 0, 0)),       # x
            _stacked_spec(p["ln1_g"].shape), _stacked_spec(p["ln1_b"].shape),
            _stacked_spec(p["wqkv"].shape), _stacked_spec(p["bqkv"].shape),
            _stacked_spec(p["wproj"].shape), _stacked_spec(p["bproj"].shape),
            _stacked_spec(p["ln2_g"].shape), _stacked_spec(p["ln2_b"].shape),
            _stacked_spec(p["w1"].shape), _stacked_spec(p["b1"].shape),
            _stacked_spec(p["w2"].shape), _stacked_spec(p["b2"].shape),
            const2d,                                                 # norm_g
            const2d,                                                 # norm_b
        ],
        out_specs=pl.BlockSpec((1, Np, D), lambda b, d: (b, 0, 0)),
        scratch_shapes=[
            pltpu.VMEM((Np, D), jnp.float32),   # residual stream across depth
            pltpu.VMEM((Np, D), jnp.float32),   # per-head attention context
        ],
        compiler_params=pltpu.CompilerParams(
            dimension_semantics=("parallel", "arbitrary"),
            vmem_limit_bytes=VMEM_LIMIT),
    )(x, p["ln1_g"], p["ln1_b"], p["wqkv"], p["bqkv"], p["wproj"], p["bproj"],
      p["ln2_g"], p["ln2_b"], p["w1"], p["b1"], p["w2"], p["b2"],
      p["norm_g"], p["norm_b"])


# ----------------------------- parameters -----------------------------

def init_params(key, *, in_chans, patch, embed_dim, depth, num_heads,
                mlp_ratio, num_patches):
    del num_heads
    D = embed_dim
    Dh = int(D * mlp_ratio)
    Kp = in_chans * patch * patch
    Kp_pad = _round_up(Kp, 128)
    keys = jax.random.split(key, 6)

    def bf16_w(k, shape):
        return (jax.random.normal(k, shape, jnp.float32) * 0.02).astype(jnp.bfloat16)

    patch_w = jax.random.normal(keys[0], (Kp, D), jnp.float32) * 0.02
    patch_w = jnp.pad(patch_w, ((0, Kp_pad - Kp), (0, 0))).astype(jnp.bfloat16)

    return {
        # Conv2d(in_chans, D, k=patch, s=patch) weight, stored (C*p*p -> pad, D).
        "patch_w": patch_w,
        "patch_b": jnp.zeros((1, D), jnp.float32),
        "cls_token": jnp.zeros((1, D), jnp.float32),                 # torch.zeros
        "pos_embed": jax.random.normal(keys[1], (num_patches + 1, D),
                                       jnp.float32) * 0.02,          # randn*0.02
        "norm_g": jnp.ones((1, D), jnp.float32),
        "norm_b": jnp.zeros((1, D), jnp.float32),
        # Per-block params stacked over depth so depth can be a grid axis.
        "ln1_g": jnp.ones((depth, 1, D), jnp.float32),
        "ln1_b": jnp.zeros((depth, 1, D), jnp.float32),
        "wqkv": bf16_w(keys[2], (depth, D, 3 * D)),
        "bqkv": jnp.zeros((depth, 1, 3 * D), jnp.float32),
        "wproj": bf16_w(keys[3], (depth, D, D)),
        "bproj": jnp.zeros((depth, 1, D), jnp.float32),
        "ln2_g": jnp.ones((depth, 1, D), jnp.float32),
        "ln2_b": jnp.zeros((depth, 1, D), jnp.float32),
        "w1": bf16_w(keys[4], (depth, D, Dh)),
        "b1": jnp.zeros((depth, 1, Dh), jnp.float32),
        "w2": bf16_w(keys[5], (depth, Dh, D)),
        "b2": jnp.zeros((depth, 1, D), jnp.float32),
    }


# ----------------------------- forward -----------------------------

def vit_forward(params, x_nchw, m=None, *, patch, num_heads):
    # `m` is only consumed by the omitted MoE adapter branch.
    B, C, H, W = x_nchw.shape
    P = (H // patch) * (W // patch)
    N = P + 1                              # + cls token
    n_pad = _round_up(N, 128)              # lane/sublane-friendly padded length
    D = params["patch_w"].shape[1]

    pos_pad = jnp.pad(params["pos_embed"], ((0, n_pad - N), (0, 0)))
    # pre(): patch_embed -> cls concat + learned pos -> (identity norm_pre)
    tokens = _patch_embed(x_nchw, params["patch_w"], params["patch_b"],
                          params["cls_token"], pos_pad, patch, n_pad)
    # blocks (+ fused final LayerNorm), padded keys masked inside the kernel
    out = _run_blocks(tokens, params, num_heads, n_valid=N)
    return out[:, :N, :]


if __name__ == "__main__":
    key = jax.random.PRNGKey(0)
    k_x, k_p = jax.random.split(key)

    # small, shape-consistent config (D multiple of 128, seq 65 -> padded 128)
    B, C, H, W = 2, 3, 32, 32
    patch, embed_dim, depth, num_heads, mlp_ratio = 4, 128, 2, 2, 4.0
    num_patches = (H // patch) * (W // patch)     # 64 -> seq len 65 with cls

    x = jax.random.normal(k_x, (B, C, H, W), jnp.float32)
    params = init_params(k_p, in_chans=C, patch=patch, embed_dim=embed_dim,
                         depth=depth, num_heads=num_heads, mlp_ratio=mlp_ratio,
                         num_patches=num_patches)

    out = vit_forward(params, x, m=None, patch=patch, num_heads=num_heads)
    out = jax.block_until_ready(out)
    assert out.shape == (B, num_patches + 1, embed_dim)
    assert bool(jnp.all(jnp.isfinite(out)))
    print("KERNEL_OK")
</pallas_src>

<mosaic_0001>
module attributes {stable_mosaic.version = 11 : i64} {
  func.func @_embed_kernel(%arg0: i32, %arg1: memref<1x64x128xbf16, #tpu.memory_space<vmem>>, %arg2: memref<128x128xbf16, #tpu.memory_space<vmem>>, %arg3: memref<1x128xf32, #tpu.memory_space<vmem>>, %arg4: memref<1x128xf32, #tpu.memory_space<vmem>>, %arg5: memref<128x128xf32, #tpu.memory_space<vmem>>, %arg6: memref<1x128x128xf32, #tpu.memory_space<vmem>>) attributes {dimension_semantics = [#tpu.dimension_semantics<parallel>], iteration_bounds = array<i64: 2>, scalar_prefetch = 0 : i64, scratch_operands = 0 : i64, tpu.core_type = #tpu.core_type<tc>, window_params = [{transform_indices = @transform_0, window_bounds = array<i64: 1, 64, 128>}, {pipeline_mode = #tpu.pipeline_mode<synchronous>, transform_indices = @transform_1, window_bounds = array<i64: 128, 128>}, {pipeline_mode = #tpu.pipeline_mode<synchronous>, transform_indices = @transform_2, window_bounds = array<i64: 1, 128>}, {pipeline_mode = #tpu.pipeline_mode<synchronous>, transform_indices = @transform_3, window_bounds = array<i64: 1, 128>}, {pipeline_mode = #tpu.pipeline_mode<synchronous>, transform_indices = @transform_4, window_bounds = array<i64: 128, 128>}, {transform_indices = @transform_5, window_bounds = array<i64: 1, 128, 128>}]} {
    %c0 = arith.constant 0 : index
    %c0_0 = arith.constant 0 : index
    %c0_1 = arith.constant 0 : index
    %0 = vector.load %arg1[%c0, %c0_0, %c0_1] : memref<1x64x128xbf16, #tpu.memory_space<vmem>>, vector<1x64x128xbf16>
    %1 = vector.shape_cast %0 : vector<1x64x128xbf16> to vector<64x128xbf16>
    %c0_2 = arith.constant 0 : index
    %c0_3 = arith.constant 0 : index
    %2 = vector.load %arg2[%c0_2, %c0_3] : memref<128x128xbf16, #tpu.memory_space<vmem>>, vector<128x128xbf16>
    %cst = arith.constant dense<0.000000e+00> : vector<64x128xf32>
    %3 = tpu.matmul %1, %2, %cst {dimension_numbers = #tpu.dot_dimension_numbers<[1], [0], [0], [1], [0, 0, 1, 1], [], []>} : vector<64x128xbf16>, vector<128x128xbf16>, vector<64x128xf32> -> vector<64x128xf32>
    %c0_4 = arith.constant 0 : index
    %c0_5 = arith.constant 0 : index
    %4 = vector.load %arg3[%c0_4, %c0_5] : memref<1x128xf32, #tpu.memory_space<vmem>>, vector<1x128xf32>
    %5 = vector.broadcast %4 : vector<1x128xf32> to vector<64x128xf32>
    %6 = arith.addf %3, %5 : vector<64x128xf32>
    %c0_6 = arith.constant 0 : index
    %c0_7 = arith.constant 0 : index
    %7 = vector.load %arg4[%c0_6, %c0_7] : memref<1x128xf32, #tpu.memory_space<vmem>>, vector<1x128xf32>
    %cst_8 = arith.constant 0.000000e+00 : f32
    %8 = vector.broadcast %cst_8 : f32 to vector<63x128xf32>
    %9 = tpu.concatenate %7, %6, %8 in 0 : vector<1x128xf32>, vector<64x128xf32>, vector<63x128xf32> -> vector<128x128xf32>
    %c0_9 = arith.constant 0 : index
    %c0_10 = arith.constant 0 : index
    %10 = vector.load %arg5[%c0_9, %c0_10] : memref<128x128xf32, #tpu.memory_space<vmem>>, vector<128x128xf32>
    %11 = arith.addf %9, %10 : vector<128x128xf32>
    %c0_11 = arith.constant 0 : index
    %c0_12 = arith.constant 0 : index
    %c0_13 = arith.constant 0 : index
    %12 = vector.load %arg6[%c0_11, %c0_12, %c0_13] : memref<1x128x128xf32, #tpu.memory_space<vmem>>, vector<1x128x128xf32>
    %13 = vector.shape_cast %12 : vector<1x128x128xf32> to vector<128x128xf32>
    %14 = vector.shape_cast %11 : vector<128x128xf32> to vector<1x128x128xf32>
    tpu.vector_store %arg6[%c0_11, %c0_12, %c0_13], %14 {strides = array<i32>} : memref<1x128x128xf32, #tpu.memory_space<vmem>>, vector<1x128x128xf32>,
    return
  }
  func.func @transform_0(%arg0: i32) -> (i32, i32, i32) {
    %c0_i32 = arith.constant 0 : i32
    %c0_i32_0 = arith.constant 0 : i32
    %c0_i32_1 = arith.constant 0 : i32
    return %arg0, %c0_i32, %c0_i32_0 : i32, i32, i32
  }
  func.func @transform_1(%arg0: i32) -> (i32, i32) {
    %c0_i32 = arith.constant 0 : i32
    %c0_i32_0 = arith.constant 0 : i32
    %c0_i32_1 = arith.constant 0 : i32
    return %c0_i32, %c0_i32_0 : i32, i32
  }
  func.func @transform_2(%arg0: i32) -> (i32, i32) {
    %c0_i32 = arith.constant 0 : i32
    %c0_i32_0 = arith.constant 0 : i32
    %c0_i32_1 = arith.constant 0 : i32
    return %c0_i32, %c0_i32_0 : i32, i32
  }
  func.func @transform_3(%arg0: i32) -> (i32, i32) {
    %c0_i32 = arith.constant 0 : i32
    %c0_i32_0 = arith.constant 0 : i32
    %c0_i32_1 = arith.constant 0 : i32
    return %c0_i32, %c0_i32_0 : i32, i32
  }
  func.func @transform_4(%arg0: i32) -> (i32, i32) {
    %c0_i32 = arith.constant 0 : i32
    %c0_i32_0 = arith.constant 0 : i32
    %c0_i32_1 = arith.constant 0 : i32
    return %c0_i32, %c0_i32_0 : i32, i32
  }
  func.func @transform_5(%arg0: i32) -> (i32, i32, i32) {
    %c0_i32 = arith.constant 0 : i32
    %c0_i32_0 = arith.constant 0 : i32
    %c0_i32_1 = arith.constant 0 : i32
    return %arg0, %c0_i32, %c0_i32_0 : i32, i32, i32
  }
}

</mosaic_0001>

<bundles_post_ra>
// kernel: tpu_custom_call.1
= control target key start
LH: loop header
LB: loop body
LE: loop exit
PB: predicated region body
PF: predicated region fallthrough
CT: control target
= control target key end

     0   :  { %10 = vsyncpa [#allocation3], 0  ;;  %s1448_s0 = inlined_call_operand.hbm [shape: bf16[2,64,128], index: 0, kind: input, shape index: {}]   ;;  %s1449_s1 = inlined_call_operand.hbm [shape: bf16[128,128], index: 1, kind: input, shape index: {}]   ;;  %s1450_s2 = inlined_call_operand.hbm [shape: f32[1,128], index: 2, kind: input, shape index: {}]   ;;  %s1451_s3 = inlined_call_operand.hbm [shape: f32[1,128], index: 3, kind: input, shape index: {}]   ;;  %s1452_s4 = inlined_call_operand.hbm [shape: f32[128,128], index: 4, kind: input, shape index: {}]   ;;  %s1453_s5 = inlined_call_operand.hbm [shape: f32[2,128,128], index: 5, kind: output, shape index: {}]  }
   0x1   :  { %12 = vsyncpa [#allocation3 + $0x1], 0 }
   0x2   :  { %13 = vsyncpa [#allocation6], 0 }
   0x3   :  { %14 = vsyncpa [#allocation9], 0 }
   0x4   :  { %15 = vsyncpa [#allocation4], 0 }
   0x5   :  { %17 = vsyncpa [#allocation4 + $0x1], 0  ;;  %s1129_s18 = smov 0   ;;  %s1131_s19 = smov 0  }
   0x6   :  { %s1133_s20 = smov 0   ;;  %s1135_s21 = smov 0  }
   0x7 LB: > { %s1150_s22 = sadd.s32 4294967295, %s1085_s21   ;;  %s675_s23 = sadd.s32 4294967294, %s1085_s21   ;;  %s1085_s21 = sphi %s1135_s21, %s1476_s21   ;;  %s1081_s20 = sphi %s1133_s20, %s1475_s20   ;;  %s1077_s19 = sphi %s1131_s19, %s1474_s19   ;;  %s1073_s18 = sphi %s1129_s18, %s1473_s18  }
   0x8   : > { %p43_p0 = scmp.ne.s32.totalorder %s1077_s19, %s1073_s18  ;;  %p1454_p1 = scmp.eq.s32.totalorder %s1150_s22, 0 }
   0x9   : > { %p157_p3 = scmp.eq.s32.totalorder %s675_s23, 1  ;;  %p676_p5 = scmp.ge.s32.totalorder %s1085_s21, 1 }
   0xa   : > { %p1159_p4 = por %p1454_p1, %p43_p0  ;;  %p164_p7 = scmp.lt.s32.totalorder %s1085_s21, 3 }
   0xb   : > { %p1164_p6 = por %p157_p3, %p43_p0  ;;  %s1087_s27 = smov [#allocation5]  }
   0xc   : > { %s1457_s24 = scalar_select %p1159_p4, 1, 0 }
   0xd   : > { %s1458_s25 = scalar_select %p1164_p6, 1, 0 }
   0xe   : > { %p1169_p8 = pnand %p676_p5, %p164_p7  ;;  %s176_s28 = sshll.u32 %s1087_s27, 4  ;;  %s1173_s28 = int_to_ptr.vmem [resolvable:$true] %s176_s28 }
   0xf   : > { %s1088_s30 = smov [#allocation8]   ;;  %s1089_s7 = smov [#allocation7]  }
  0x10   : > { %s1459_s26 = scalar_select %p1169_p8, 1, 0 }
  0x11   : > { %p784_p9 = pneg %p1169_p8  ;;  %s201_s6 = sshll.u32 %s1088_s30, 4  ;;  %s1184_s6 = int_to_ptr.vmem [resolvable:$true] %s201_s6 }
  0x12   : > { %s1186_s8 = sshll.u32 %s1089_s7, 4  ;;  %s869_s11 = scalar_lea.hbm %s1449_s1, 1024  ;;  %s191_s8 = int_to_ptr.vmem [resolvable:$true] %s1186_s8 }
  0x13   : > { %p1180_p11 = pnand %p784_p9, %p1454_p1  ;;  %p870_p12 = scmp.ne.s32.totalorder %s1449_s1, %s869_s11 }
  0x14   : > { %p876_p5 = scmp.lt.u32.totalorder %s869_s11, %s1449_s1 }
  0x15   : > { %p1196_p13 = pneg %p1180_p11 }
  0x17   : > { %p872_p0 = pnand %p1196_p13, %p870_p12 }
  0x19   : > { %p873_p3 = pneg %p872_p0 }
  0x1b   : > { %p878_p7 = pnand %p876_p5, %p873_p3 }
  0x1d   : > { %881 = shalt.err (!%p878_p7)
}
  0x1e   : > { %s882_s17 = scalar_lea.vmem %s1173_s28, 1024  ;;  %p890_p2 = scmp.lt.s32.totalorder %s1173_s28, %s1173_s28 }
  0x1f   : > { %p883_p9 = scmp.ne.s32.totalorder %s1173_s28, %s882_s17  ;;  %p891_p6 = scmp.lt.s32.totalorder %s882_s17, %s882_s17 }
  0x21   : > { %p885_p10 = pnand %p883_p9, %p1196_p13  ;;  %p892_p12 = por %p891_p6, %p890_p2 }
  0x23   : > { %p886_p1 = pneg %p885_p10 }
  0x25   : > { %p893_p0 = pnand %p892_p12, %p886_p1 }
  0x27   : > { %896 = shalt.err (!%p893_p0)
}
  0x28   : > { %s1090_s23 = smov 64   ;;  %s1091_s27 = smov 4  }
  0x29   : > { %787 = dma.hbm_to_vmem [thread:$0]  (!%p1180_p11), %s1449_s1, 1024, %s1173_s28, [#allocation6], %s1090_s23, %s1090_s23, %s1091_s27  }
  0x2a   : > { %s897_s11 = scalar_lea.hbm %s1451_s3, 16 }
  0x2b   : > { %p898_p1 = scmp.ne.s32.totalorder %s1451_s3, %s897_s11  ;;  %p904_p10 = scmp.lt.u32.totalorder %s897_s11, %s1451_s3 }
  0x2d   : > { %p900_p2 = pnand %p898_p1, %p1196_p13 }
  0x2f   : > { %p901_p6 = pneg %p900_p2 }
  0x31   : > { %p906_p3 = pnand %p904_p10, %p901_p6 }
  0x33   : > { %909 = shalt.err (!%p906_p3)
}
  0x34   : > { %s910_s28 = scalar_lea.vmem %s1184_s6, 16  ;;  %s917_s17 = scalar_lea.vmem %s1184_s6, 32 }
  0x35   : > { %p911_p5 = scmp.ne.s32.totalorder %s1184_s6, %s910_s28  ;;  %p918_p12 = scmp.lt.s32.totalorder %s1184_s6, %s1184_s6 }
  0x36   : > { %p919_p0 = scmp.lt.s32.totalorder %s917_s17, %s910_s28 }
  0x37   : > { %p913_p7 = pnand %p911_p5, %p1196_p13 }
  0x38   : > { %p920_p1 = por %p919_p0, %p918_p12 }
  0x39   : > { %p914_p9 = pneg %p913_p7 }
  0x3b   : > { %p921_p2 = pnand %p920_p1, %p914_p9 }
  0x3d   : > { %924 = shalt.err (!%p921_p2)
}
  0x3e   : > { %793 = dma.hbm_to_vmem [thread:$0]  (!%p1180_p11), %s1451_s3, 16, %s1184_s6, [#allocation9]  }
  0x3f   : > { %s925_s11 = scalar_lea.hbm %s1450_s2, 16 }
  0x40   : > { %p926_p6 = scmp.ne.s32.totalorder %s1450_s2, %s925_s11  ;;  %p932_p5 = scmp.lt.u32.totalorder %s925_s11, %s1450_s2 }
  0x42   : > { %p928_p10 = pnand %p926_p6, %p1196_p13 }
  0x44   : > { %p929_p3 = pneg %p928_p10 }
  0x46   : > { %p934_p7 = pnand %p932_p5, %p929_p3 }
  0x48   : > { %937 = shalt.err (!%p934_p7)
}
  0x49   : > { %s938_s28 = scalar_lea.vmem %s191_s8, 16  ;;  %s945_s6 = scalar_lea.vmem %s191_s8, 32 }
  0x4a   : > { %p939_p9 = scmp.ne.s32.totalorder %s191_s8, %s938_s28  ;;  %p946_p1 = scmp.lt.s32.totalorder %s191_s8, %s191_s8 }
  0x4b   : > { %p947_p2 = scmp.lt.s32.totalorder %s945_s6, %s938_s28 }
  0x4c   : > { %p941_p12 = pnand %p939_p9, %p1196_p13 }
  0x4d   : > { %p948_p4 = por %p947_p2, %p946_p1 }
  0x4e   : > { %p942_p0 = pneg %p941_p12 }
  0x50   : > { %p949_p8 = pnand %p948_p4, %p942_p0 }
  0x52   : > { %952 = shalt.err (!%p949_p8)
}
  0x53   : > { %790 = dma.hbm_to_vmem [thread:$0]  (!%p1180_p11), %s1450_s2, 16, %s191_s8, [#allocation6]  }
  0x54   : > { %s1092_s7 = smov [#allocation10]   ;;  %s953_s12 = scalar_lea.hbm %s1452_s4, 2048 }
  0x55   : > { %s211_s9 = sshll.u32 %s1092_s7, 4  ;;  %p954_p6 = scmp.ne.s32.totalorder %s1452_s4, %s953_s12  ;;  %s212_s9 = int_to_ptr.vmem [resolvable:$true] %s211_s9 }
  0x56   : > { %p960_p10 = scmp.lt.u32.totalorder %s953_s12, %s1452_s4 }
  0x57   : > { %p956_p4 = pnand %p954_p6, %p1196_p13 }
  0x59   : > { %p957_p8 = pneg %p956_p4 }
  0x5b   : > { %p962_p3 = pnand %p960_p10, %p957_p8 }
  0x5d   : > { %965 = shalt.err (!%p962_p3)
}
  0x5e   : > { %s966_s8 = scalar_lea.vmem %s212_s9, 2048  ;;  %p974_p12 = scmp.lt.s32.totalorder %s212_s9, %s212_s9 }
  0x5f   : > { %p967_p5 = scmp.ne.s32.totalorder %s212_s9, %s966_s8  ;;  %p975_p0 = scmp.lt.s32.totalorder %s966_s8, %s966_s8 }
  0x61   : > { %p969_p7 = pnand %p967_p5, %p1196_p13  ;;  %p976_p1 = por %p975_p0, %p974_p12 }
  0x63   : > { %p970_p9 = pneg %p969_p7 }
  0x65   : > { %p977_p2 = pnand %p976_p1, %p970_p9 }
  0x67   : > { %980 = shalt.err (!%p977_p2)
}
  0x68   : > { %s1093_s6 = smov 128   ;;  %s1094_s14 = smov 8  }
  0x69   : > { %796 = dma.hbm_to_vmem [thread:$0]  (!%p1180_p11), %s1452_s4, 2048, %s212_s9, [#allocation9], %s1093_s6, %s1093_s6, %s1094_s14  }
  0x6a   : > { %s1282_s7 = sadd.s32 1, %s1085_s21   ;;  %s30_s11 = sadd.s32 1, %s1081_s20 }
  0x6b   : > { %s27_s10 = ssub.s32 %s1085_s21, %s1282_s7  ;;  %p37_p6 = scmp.ne.s32.totalorder %s1081_s20, %s1077_s19 }
  0x6c   : > { %p28_p13 = scmp.eq.s32.totalorder %s27_s10, 0  ;;  %p38_p4 = scmp.eq.s32.totalorder %s1085_s21, 0 }
  0x6d   : > { %p1462_p10 = scmp.eq.s32.totalorder %s1150_s22, 1  ;;  %p809_p5 = scmp.lt.s32.totalorder %s1085_s21, 2 }
  0x6e   : > { %s1291_s12 = scalar_select %p28_p13, %s1081_s20, %s30_s11  }
  0x6f   : > { %p39_p8 = por %p38_p4, %p37_p6  ;;  %p1295_p3 = por %p1462_p10, %p37_p6 }
  0x70   : > { %s225_s29 = sand.u32 1, %s1081_s20   ;;  %s710_s9 = sshll.u32 %s1085_s21, 9 }
  0x71   : > { %s682_s15 = sshll.u32 %s225_s29, 5  ;;  %s1305_s8 = scalar_lea.hbm %s1448_s0, %s710_s9 }
  0x72   : > { %s229_s6 = scalar_lea.vmem [#allocation2], %s682_s15  ;;  %p1309_p11 = pnand %p809_p5, %p39_p8 }
  0x73   : > { %s236_s14 = sshll.u32 %s229_s6, 4  ;;  %s1313_s30 = scalar_lea.sflag [#allocation3], %s225_s29  ;;  %s1307_s14 = int_to_ptr.vmem [resolvable:$true] %s236_s14 }
  0x74   : > { %s981_s10 = scalar_lea.hbm %s1305_s8, 512  ;;  %p983_p9 = pneg %p1309_p11 }
  0x75   : > { %p982_p7 = scmp.ne.s32.totalorder %s1305_s8, %s981_s10  ;;  %s986_s9 = scalar_lea.hbm %s1448_s0, 1024 }
  0x76   : > { %p987_p1 = scmp.lt.u32.totalorder %s1305_s8, %s1448_s0  ;;  %p988_p2 = scmp.lt.u32.totalorder %s986_s9, %s981_s10 }
  0x77   : > { %p984_p12 = pnand %p983_p9, %p982_p7  ;;  %p990_p6 = scmp.lt.u32.totalorder %s981_s10, %s1305_s8 }
  0x78   : > { %p989_p13 = por %p988_p2, %p987_p1 }
  0x79   : > { %p985_p0 = pneg %p984_p12 }
  0x7a   : > { %p991_p4 = por %p990_p6, %p989_p13 }
  0x7c   : > { %p992_p8 = pnand %p991_p4, %p985_p0 }
  0x7e   : > { %995 = shalt.err (!%p992_p8)
}
  0x7f   : > { %s996_s29 = scalar_lea.vmem %s1307_s14, 512  ;;  %s1095_s6 = smov [#allocation2]  }
  0x80   : > { %p997_p10 = scmp.ne.s32.totalorder %s1307_s14, %s996_s29  ;;  %s1001_s11 = sshll.u32 %s1095_s6, 4  ;;  %s1002_s11 = int_to_ptr.vmem [resolvable:$false] %s1001_s11 }
  0x81   : > { %s1003_s15 = scalar_lea.vmem %s1002_s11, 1024  ;;  %p1004_p12 = scmp.lt.s32.totalorder %s1307_s14, %s1002_s11 }
  0x82   : > { %p999_p5 = pnand %p997_p10, %p983_p9  ;;  %p1005_p1 = scmp.lt.s32.totalorder %s1003_s15, %s996_s29 }
  0x84   : > { %p1000_p7 = pneg %p999_p5  ;;  %p1006_p2 = por %p1005_p1, %p1004_p12 }
  0x86   : > { %p1007_p13 = pnand %p1006_p2, %p1000_p7 }
  0x88   : > { %1010 = shalt.err (!%p1007_p13)
}
  0x89   : > { %800 = dma.hbm_to_vmem [thread:$0]  (!%p1309_p11), %s1305_s8, 512, %s1307_s14, %s1313_s30, %s1090_s23, %s1090_s23, %s1091_s27  }
  0x8a   : > { %p1465_p9 = scmp.ne.s32.totalorder %s1459_s26, 0 }
  0x8b   : > { %s1347_s10 = sand.u32 (!%p1465_p9), 1, %s1077_s19   ;;  %p1466_p0 = scmp.ne.s32.totalorder (!%p1465_p9), %s1457_s24, 0 }
  0x8c   : > { %248 = sbr.rel (%p1465_p9) target bundleno = 427 (0x1ab), region = 40  ;;  %s686_s9 = sshll.u32 (!%p1465_p9), %s1347_s10, 5 }
  0x8d   : > { %s251_s16 = scalar_lea.sflag (!%p1465_p9), [#allocation3], %s1347_s10  ;;  %s1351_s28 = scalar_lea.vmem (!%p1465_p9), [#allocation2], %s686_s9 }
  0x93   : > { %1056 = dma.done.wait (%p1466_p0), %s251_s16, 512  }
  0x94   : > { %1058 = vsyncadd (%p1466_p0), %s251_s16, 4294966784  ;;  %p1467_p11 = scmp.eq.s32.totalorder %s1150_s22, 0 }
  0x96   : > { %1060 = dma.done.wait (%p1467_p11), [#allocation6], 1040   ;;  %p1468_p6 = pmov %p1467_p11 }
  0x98   : > { %1062 = vsyncadd (%p1468_p6), [#allocation6], 4294966256  ;;  %p1469_p4 = pmov %p1468_p6 }
  0x9a   : > { %1064 = dma.done.wait (%p1469_p4), [#allocation9], 2064   ;;  %p1470_p8 = pmov %p1469_p4 }
  0x9b   : > { %v857_v0 = vld [vmem:[#allocation5] sm:$0xff]   ;;  %v858_v1 = vld [vmem:[#allocation5 + $0x8] sm:$0xff]   ;;  %v859_v2 = vld [vmem:[#allocation5 + $0x10] sm:$0xff]   ;;  %s691_s24 = sshll.u32 %s1347_s10, 7  ;;  %vm475_vm0 = vcmask 1040384   ;;  %s711_s23 = sshll.u32 %s1150_s22, 11 }
  0x9c   : > { %1066 = vsyncadd (%p1470_p8), [#allocation9], 4294965232  ;;  %724 = vmatprep.subr.bf16.mxu0 %v857_v0  ;;  %748 = vmatprep.subr.bf16.mxu1 %v857_v0  ;;  %v860_v3 = vld [vmem:[#allocation5 + $0x18] sm:$0xff]   ;;  %v865_v4 = vld [vmem:[%s1351_s28] sm:$0xff]   ;;  %s1370_s26 = scalar_lea.vmem [#allocation11], %s691_s24  ;;  %s1397_s14 = scalar_lea.hbm %s1453_s5, %s711_s23 }
  0x9d   : > { %725 = vmatpush3.bf16.msra.mxu0 %v857_v0  ;;  %756 = vmatpush3.bf16.msra.mxu1 %v857_v0  ;;  %v866_v5 = vld [vmem:[%s1351_s28 + $0x10] sm:$0xff]   ;;  %v861_v6 = vld [vmem:[#allocation5 + $0x20] sm:$0xff]   ;;  %v862_v7 = vld [vmem:[#allocation5 + $0x28] sm:$0xff]   ;;  %s564_s27 = sshll.u32 %s1370_s26, 4  ;;  %s551_s17 = scalar_lea.sflag [#allocation4], %s1347_s10  ;;  %s1399_s27 = int_to_ptr.vmem [resolvable:$true] %s564_s27 }
  0x9e   : > { %726 = vmatprep.subr.bf16.mxu0 %v858_v1  ;;  %749 = vmatprep.subr.bf16.mxu1 %v858_v1  ;;  %v863_v8 = vld [vmem:[#allocation5 + $0x30] sm:$0xff]   ;;  %v864_v9 = vld [vmem:[#allocation5 + $0x38] sm:$0xff]   ;;  %v867_v10 = vld [vmem:[%s1351_s28 + $0x8] sm:$0xff]   ;;  %s1011_s30 = scalar_lea.vmem %s1399_s27, 2048  ;;  %s1096_s29 = smov [#allocation11]  }
  0x9f   : > { %740 = vmatprep.mubr.bf16.mxu0 %v865_v4  ;;  %744 = vmatprep.mubr.bf16.mxu1 %v866_v5  ;;  %v868_v11 = vld [vmem:[%s1351_s28 + $0x18] sm:$0xff]   ;;  %v511_v12 = vld [vmem:[#allocation10 + $0x48] sm:$0xff]  ;;  %v514_v15 = vld [vmem:[#allocation10 + $0x60] sm:$0xff]  ;;  %p1012_p10 = scmp.ne.s32.totalorder %s1399_s27, %s1011_s30  ;;  %s1015_s6 = sshll.u32 %s1096_s29, 4  ;;  %s1016_s6 = int_to_ptr.vmem [resolvable:$false] %s1015_s6 }
  0xa0   : > { %v512_v13 = vld [vmem:[#allocation10 + $0x50] sm:$0xff]  ;;  %v513_v14 = vld [vmem:[#allocation10 + $0x58] sm:$0xff]  ;;  %v515_v16 = vld [vmem:[#allocation10 + $0x68] sm:$0xff]  ;;  %543 = vst [vmem:[%s1370_s26 + $0x48] sm:$0xff] %v511_v12  ;;  %s1017_s11 = scalar_lea.vmem %s1016_s6, 4096  ;;  %p1018_p12 = scmp.lt.s32.totalorder %s1399_s27, %s1016_s6 }
  0xa1   : > { %727 = vmatpush3.bf16.msra.mxu0 %v858_v1  ;;  %757 = vmatpush3.bf16.msra.mxu1 %v858_v1  ;;  %v516_v17 = vld [vmem:[#allocation10 + $0x70] sm:$0xff]  ;;  %544 = vst [vmem:[%s1370_s26 + $0x50] sm:$0xff] %v512_v13  ;;  %545 = vst [vmem:[%s1370_s26 + $0x58] sm:$0xff] %v513_v14  ;;  %v517_v18 = vld [vmem:[#allocation10 + $0x78] sm:$0xff]  ;;  %p1013_p5 = pnand %p1012_p10, %p1295_p3  ;;  %p1019_p1 = scmp.lt.s32.totalorder %s1017_s11, %s1011_s30 }
  0xa2   : > { %728 = vmatprep.subr.bf16.mxu0 %v859_v2  ;;  %750 = vmatprep.subr.bf16.mxu1 %v859_v2  ;;  %546 = vst [vmem:[%s1370_s26 + $0x60] sm:$0xff] %v514_v15  ;;  %547 = vst [vmem:[%s1370_s26 + $0x68] sm:$0xff] %v515_v16  ;;  %v692_v19 = vld [vmem:[#allocation7] ss:$0 sm:$0xff]  ;;  %v466_v30 = vld [vmem:[#allocation8] sm:$0x1] }
  0xa3   : > { %548 = vst [vmem:[%s1370_s26 + $0x70] sm:$0xff] %v516_v17  ;;  %549 = vst [vmem:[%s1370_s26 + $0x78] sm:$0xff] %v517_v18  ;;  %v502_v36 = vld [vmem:[#allocation10] sm:$0xff]  ;;  %v505_v38 = vld [vmem:[#allocation10 + $0x18] sm:$0xff]  ;;  %p1014_p7 = pneg %p1013_p5  ;;  %p1020_p2 = por %p1019_p1, %p1018_p12 }
  0xa4   : > { %v506_v44 = vld [vmem:[#allocation10 + $0x20] sm:$0xff]  ;;  %v509_v46 = vld [vmem:[#allocation10 + $0x38] sm:$0xff]  ;;  %v503_v55 = vld [vmem:[#allocation10 + $0x8] sm:$0xff] }
  0xa5   : > { %729 = vmatpush3.bf16.msra.mxu0 %v859_v2  ;;  %758 = vmatpush3.bf16.msra.mxu1 %v859_v2  ;;  %v510_v48 = vld [vmem:[#allocation10 + $0x40] sm:$0xff]  ;;  %v504_v56 = vld [vmem:[#allocation10 + $0x10] sm:$0xff]  ;;  %v507_v57 = vld [vmem:[#allocation10 + $0x28] sm:$0xff]  ;;  %p1021_p13 = pnand %p1020_p2, %p1014_p7 }
  0xa6   : > { %730 = vmatprep.subr.bf16.mxu0 %v860_v3  ;;  %751 = vmatprep.subr.bf16.mxu1 %v860_v3  ;;  %v508_v62 = vld [vmem:[#allocation10 + $0x30] sm:$0xff] }
  0xa9   : > { %731 = vmatpush3.bf16.msra.mxu0 %v860_v3  ;;  %759 = vmatpush3.bf16.msra.mxu1 %v860_v3 }
  0xaa   : > { %732 = vmatprep.subr.bf16.mxu0 %v861_v6  ;;  %752 = vmatprep.subr.bf16.mxu1 %v861_v6 }
  0xad   : > { %733 = vmatpush3.bf16.msra.mxu0 %v861_v6  ;;  %760 = vmatpush3.bf16.msra.mxu1 %v861_v6 }
  0xae   : > { %734 = vmatprep.subr.bf16.mxu0 %v862_v7  ;;  %753 = vmatprep.subr.bf16.mxu1 %v862_v7 }
  0xb1   : > { %735 = vmatpush3.bf16.msra.mxu0 %v862_v7  ;;  %761 = vmatpush3.bf16.msra.mxu1 %v862_v7 }
  0xb2   : > { %736 = vmatprep.subr.bf16.mxu0 %v863_v8  ;;  %754 = vmatprep.subr.bf16.mxu1 %v863_v8 }
  0xb5   : > { %737 = vmatpush3.bf16.msra.mxu0 %v863_v8  ;;  %762 = vmatpush3.bf16.msra.mxu1 %v863_v8 }
  0xb6   : > { %738 = vmatprep.subr.bf16.mxu0 %v864_v9  ;;  %755 = vmatprep.subr.bf16.mxu1 %v864_v9 }
  0xb9   : > { %739 = vmatpush3.bf16.msra.mxu0 %v864_v9  ;;  %763 = vmatpush3.bf16.msra.mxu1 %v864_v9 }
  0xbc   : > { %741 = vmatmul.mubr.bf16.vlgmr.msra.gmra.mrb[0].mxu0 %v867_v10  ;;  %745 = vmatmul.mubr.bf16.vlgmr.msra.gmra.mrb[0].mxu1 %v868_v11 }
 0x18f   : > { %v742_v20 = vpop.f32.mrb[0].mxu0  ;;  %v746_v21 = vpop.f32.mrb[0].mxu1 }
 0x190   : > { %v444_v22 = vadd.f32 %v742_v20, %v692_v19  ;;  %v460_v23 = vadd.f32 %v746_v21, %v692_v19  ;;  %v435_v24 = vpop.f32.mrb[1].mxu0  ;;  %v451_v25 = vpop.f32.mrb[1].mxu1 }
 0x191   : > { %v436_v26 = vadd.f32 %v692_v19, %v435_v24  ;;  %v452_v27 = vadd.f32 %v692_v19, %v451_v25  ;;  %v743_v28 = vpop.f32.mrb[2].mxu0  ;;  %v747_v29 = vpop.f32.mrb[2].mxu1 }
 0x192   : > { %v447_v31 = vadd.f32 %v743_v28, %v692_v19  ;;  %v463_v32 = vadd.f32 %v747_v29, %v692_v19  ;;  %v438_v33 = vpop.f32.mrb[3].mxu0  ;;  %v454_v34 = vpop.f32.mrb[3].mxu1  ;;  %v479_v41 = vrot.slane %v444_v22, 7  ;;  %v487_v42 = vrot.slane %v460_v23, 7 }
 0x193   : > { %v476_v35 = vrot.slane %v436_v26, 7  ;;  %v483_v37 = vrot.slane %v452_v27, 7  ;;  %v439_v39 = vadd.f32 %v692_v19, %v438_v33  ;;  %v455_v40 = vadd.f32 %v692_v19, %v454_v34 }
 0x194   : > { %v481_v43 = vrot.slane %v447_v31, 7  ;;  %v489_v45 = vrot.slane %v463_v32, 7 }
 0x195   : > { %v500_v47 = vsel %vm475_vm0, %v466_v30, %v476_v35  ;;  %v477_v49 = vrot.slane %v439_v39, 7  ;;  %v485_v50 = vrot.slane %v455_v40, 7 }
 0x196   : > { %v518_v51 = vadd.f32 %v502_v36, %v500_v47  ;;  %v482_v52 = vsel %vm475_vm0, %v479_v41, %v481_v43  ;;  %v484_v53 = vsel %vm475_vm0, %v481_v43, %v483_v37  ;;  %v490_v54 = vsel %vm475_vm0, %v487_v42, %v489_v45 }
 0x197   : > { %v521_v58 = vadd.f32 %v505_v38, %v482_v52  ;;  %v522_v59 = vadd.f32 %v506_v44, %v484_v53  ;;  %v501_v60 = vsel %vm475_vm0, %v489_v45, 0.0  ;;  %v525_v61 = vadd.f32 %v509_v46, %v490_v54 }
 0x198   : > { %534 = vst [vmem:[%s1370_s26] sm:$0xff] %v518_v51  ;;  %v526_v63 = vadd.f32 %v510_v48, %v501_v60  ;;  %v478_v0 = vsel %vm475_vm0, %v476_v35, %v477_v49  ;;  %v480_v1 = vsel %vm475_vm0, %v477_v49, %v479_v41  ;;  %v486_v2 = vsel %vm475_vm0, %v483_v37, %v485_v50 }
 0x199   : > { %537 = vst [vmem:[%s1370_s26 + $0x18] sm:$0xff] %v521_v58  ;;  %538 = vst [vmem:[%s1370_s26 + $0x20] sm:$0xff] %v522_v59  ;;  %v519_v3 = vadd.f32 %v503_v55, %v478_v0  ;;  %v520_v4 = vadd.f32 %v504_v56, %v480_v1  ;;  %v488_v5 = vsel %vm475_vm0, %v485_v50, %v487_v42 }
 0x19a   : > { %541 = vst [vmem:[%s1370_s26 + $0x38] sm:$0xff] %v525_v61  ;;  %v523_v6 = vadd.f32 %v507_v57, %v486_v2  ;;  %542 = vst [vmem:[%s1370_s26 + $0x40] sm:$0xff] %v526_v63  ;;  %v524_v7 = vadd.f32 %v508_v62, %v488_v5 }
 0x19b   : > { %535 = vst [vmem:[%s1370_s26 + $0x8] sm:$0xff] %v519_v3  ;;  %536 = vst [vmem:[%s1370_s26 + $0x10] sm:$0xff] %v520_v4 }
 0x19c   : > { %539 = vst [vmem:[%s1370_s26 + $0x28] sm:$0xff] %v523_v6  ;;  %540 = vst [vmem:[%s1370_s26 + $0x30] sm:$0xff] %v524_v7 }
 0x19d   : > { %1024 = shalt.err (!%p1021_p13)
}
 0x19e   : > { %s1025_s15 = scalar_lea.hbm %s1397_s14, 2048  ;;  %s1029_s28 = scalar_lea.hbm %s1453_s5, 4096 }
 0x19f   : > { %p1026_p9 = scmp.ne.s32.totalorder %s1397_s14, %s1025_s15  ;;  %p1030_p6 = scmp.lt.u32.totalorder %s1397_s14, %s1453_s5 }
 0x1a0   : > { %p1031_p4 = scmp.lt.u32.totalorder %s1029_s28, %s1025_s15  ;;  %p1033_p10 = scmp.lt.u32.totalorder %s1025_s15, %s1397_s14 }
 0x1a1   : > { %p1027_p0 = pnand %p1026_p9, %p1295_p3 }
 0x1a2   : > { %p1032_p8 = por %p1031_p4, %p1030_p6 }
 0x1a3   : > { %p1028_p11 = pneg %p1027_p0 }
 0x1a4   : > { %p1034_p5 = por %p1033_p10, %p1032_p8 }
 0x1a6   : > { %p1035_p7 = pnand %p1034_p5, %p1028_p11 }
 0x1a8   : > { %1038 = shalt.err (!%p1035_p7)
}
 0x1a9   : > { %s1097_s23 = smov 128   ;;  %s1098_s22 = smov 8  }
 0x1aa   : > { %782 = dma.vmem_to_hbm [thread:$0]  (%p1295_p3), %s1399_s27, 2048, %s1397_s14, %s551_s17, %s1097_s23, %s1097_s23, %s1098_s22  }
 0x1ab PF: > { %s579_s8 = sand.u32 1, %s1073_s18   ;;  %p1471_p12 = scmp.ne.s32.totalorder %s1458_s25, 0 }
 0x1ac   : > { %p1472_p1 = scmp.ge.s32.totalorder %s1085_s21, 2  ;;  %s580_s30 = scalar_lea.sflag [#allocation4], %s579_s8 }
 0x1ae   : > { %p802_p2 = pnand %p1472_p1, %p1471_p12 }
 0x1b0   : > { %1068 = dma.done.wait (!%p802_p2), %s580_s30, 2048  }
 0x1b1   : > { %1070 = vsyncadd (!%p802_p2), %s580_s30, 4294965248  ;;  %p20_p13 = scmp.ge.s32.totalorder %s1282_s7, 4   ;;  %s1473_s18 = smov %s1077_s19 }
 0x1b2   : > { %s1474_s19 = smov %s1081_s20  ;;  %s1475_s20 = smov %s1291_s12 }
 0x1b3   : > { %s1476_s21 = smov %s1282_s7  ;;  %22 = sbr.rel (!%p20_p13) target bundleno = 7 (0x7), region = 101 }
 0x1ba   :  { %585 = vsyncpa [#allocation3], 1 }
 0x1bb   :  { %587 = vsyncpa [#allocation3 + $0x1], 1 }
 0x1bc   :  { %588 = vsyncpa [#allocation6], 1 }
 0x1bd   :  { %589 = vsyncpa [#allocation9], 1 }
 0x1be   :  { %590 = vsyncpa [#allocation4], 1 }
 0x1bf   :  { %592 = vsyncpa [#allocation4 + $0x1], 1 }

</bundles_post_ra>
